<compile_context>
chip_gen: v6e
topology: v6e:2x2x1
jax: 0.10.0
libtpu: 0.0.40
codegen_flags: <defaults>
</compile_context>

<pallas_src>
import functools
import math

import jax
import jax.numpy as jnp
from jax.experimental import pallas as pl
from jax.experimental.pallas import tpu as pltpu


# ------------------------------ tiling helper --------------------------------


def _pick_tile(dim, target, *aligns):
    """Largest aligned divisor of `dim` <= target (alignments tried in order),
    else the full dim (a block equal to the array dim is always legal)."""
    if dim <= target:
        return dim
    for align in aligns:
        t = (target // align) * align
        while t >= align:
            if dim % t == 0:
                return t
            t -= align
    return dim


# ------------------------------ Pallas kernels --------------------------------


def _linear_kernel(x_ref, w_ref, b_ref, o_ref, acc_ref):
    """One (tm, tn) tile of y = x @ w + b, accumulated over the k grid axis.

    x_ref: (tm, tk) f32/bf16 (cast to bf16 in-kernel so the wrapper never does
    a separate HBM cast pass), w_ref: (tk, tn) bf16 (pre-transposed once at
    param-prep time), b_ref: (1, tn) f32, acc f32."""
    k = pl.program_id(2)

    @pl.when(k == 0)
    def _():
        acc_ref[...] = jnp.zeros_like(acc_ref)

    acc_ref[...] += jnp.dot(x_ref[...].astype(jnp.bfloat16), w_ref[...],
                            preferred_element_type=jnp.float32)

    @pl.when(k == pl.num_programs(2) - 1)
    def _():
        o_ref[...] = (acc_ref[...] + b_ref[...]).astype(o_ref.dtype)


def _attn_kernel(q_ref, k_ref, v_ref, o_ref, m_sc, l_sc, acc_sc, *,
                 num_heads, head_dim):
    """Flash-style attention on lane-dense (rows, E) tiles.

    grid = (B, n_q, n_kv); the kv axis is an online-softmax reduction carried
    in f32 VMEM scratch.  q_ref: (tq, E) bf16, k_ref/v_ref: (tkv, E) bf16,
    o_ref: (tq, E) bf16.  The 1/sqrt(D) scale is already folded (as D**-0.25)
    into the shared Q/K projection weights, so no per-element scale here.

    Heads are a static Python loop over *static* lane slices (free ref views,
    2-D MXU matmuls only).  With head_dim < 128 the head axis cannot go on the
    grid (per-head blocks would break the 128-lane rule) and a fori_loop would
    need dynamic lane slicing (per-step lane rotates), so the static unroll is
    the cheapest legal option; tq is kept moderate to bound register pressure.
    # TODO(synk): move the head loop onto a "parallel" grid axis when head_dim >= 128.
    """
    kv = pl.program_id(2)

    @pl.when(kv == 0)
    def _():
        m_sc[...] = jnp.full_like(m_sc, -jnp.inf)
        l_sc[...] = jnp.zeros_like(l_sc)
        acc_sc[...] = jnp.zeros_like(acc_sc)

    D = head_dim
    for h in range(num_heads):
        sl = slice(h * D, (h + 1) * D)
        q = q_ref[:, sl]                                    # (tq, D)  bf16
        k = k_ref[:, sl]                                    # (tkv, D) bf16
        v = v_ref[:, sl]                                    # (tkv, D) bf16
        # q @ k^T via dot_general contracting D of both operands: bf16 MXU
        # inputs, f32 accumulation, no in-kernel transpose of k.
        s = jax.lax.dot_general(q, k, (((1,), (1,)), ((), ())),
                                preferred_element_type=jnp.float32)  # (tq, tkv)
        hcol = slice(h, h + 1)
        m_prev = m_sc[:, hcol]                              # (tq, 1) f32
        m_new = jnp.maximum(m_prev, jnp.max(s, axis=-1, keepdims=True))
        alpha = jnp.exp(m_prev - m_new)                     # f32 softmax math
        p = jnp.exp(s - m_new)                              # (tq, tkv) f32
        l_sc[:, hcol] = alpha * l_sc[:, hcol] + jnp.sum(p, axis=-1, keepdims=True)
        acc_sc[:, sl] = alpha * acc_sc[:, sl] + jnp.dot(
            p.astype(v.dtype), v, preferred_element_type=jnp.float32)
        m_sc[:, hcol] = m_new

    @pl.when(kv == pl.num_programs(2) - 1)
    def _():
        inv = pl.reciprocal(l_sc[...], approx=True)         # (tq, H), EUP slot
        # Expand per-head denominators to (tq, E) and do ONE lane-dense store
        # (no per-head masked vst on the output ref).
        inv_full = jnp.concatenate(
            [jnp.broadcast_to(inv[:, h:h + 1], (inv.shape[0], D))
             for h in range(num_heads)], axis=1)
        o_ref[...] = (acc_sc[...] * inv_full).astype(o_ref.dtype)


# -------------------------------- wrappers ------------------------------------


def pallas_linear(x, w_t, b, out_dtype,
                  tm_target=512, tn_target=512, tk_target=512):
    """y = x @ w_t + b, tiled & pipelined.

    x: (M, K) f32/bf16, w_t: (K, N) bf16 (pre-transposed), b: (N,) f32.
    512-tiles with double buffering need only ~5-6 MiB of VMEM, well within
    every generation's budget; vmem_limit_bytes raises the scoped default."""
    M, K = x.shape
    K2, N = w_t.shape
    assert K == K2
    tm = _pick_tile(M, tm_target, 16, 8)
    tn = _pick_tile(N, tn_target, 128)
    tk = _pick_tile(K, tk_target, 128)
    grid = (M // tm, N // tn, K // tk)
    return pl.pallas_call(
        _linear_kernel,
        out_shape=jax.ShapeDtypeStruct((M, N), out_dtype),
        grid=grid,
        in_specs=[
            pl.BlockSpec((tm, tk), lambda i, j, k: (i, k)),
            pl.BlockSpec((tk, tn), lambda i, j, k: (k, j)),
            pl.BlockSpec((1, tn), lambda i, j, k: (0, j)),
        ],
        out_specs=pl.BlockSpec((tm, tn), lambda i, j, k: (i, j)),
        scratch_shapes=[pltpu.VMEM((tm, tn), jnp.float32)],
        compiler_params=pltpu.CompilerParams(
            dimension_semantics=("parallel", "parallel", "arbitrary"),
            vmem_limit_bytes=64 * 1024 * 1024),
    )(x, w_t, b.reshape(1, N))


def pallas_attention(q, k, v, *, batch, num_heads, head_dim,
                     chunks=(0, 0, 0), nchunks=(1, 1, 1),
                     tq_target=256, tkv_target=512):
    """q: (L, B*nq, E), k/v: (S, B*nk, E) bf16 -> (L, B, E) bf16.

    `chunks`/`nchunks` let a fused (rows, B*nc, E) projection output be passed
    directly (possibly the same array for q/k/v); index_maps select the chunk,
    so no host-side slice/transpose round trips through HBM.  The middle
    (batch*chunk) axis is squeezed out of the blocks, so every DMA and VMEM
    buffer is lane-dense (rows, E).  grid = (B, n_q, n_kv): query tiling
    bounds VMEM for long sequences (v7x-critical)."""
    L = q.shape[0]
    S = k.shape[0]
    B, H, D = batch, num_heads, head_dim
    E = H * D
    cq, ck, cv = chunks
    nq, nk, nv = nchunks
    tq = _pick_tile(L, tq_target, 16, 8)
    tkv = _pick_tile(S, tkv_target, 128, 8)   # 128: lane dim of the score tile
    n_q = L // tq
    n_kv = S // tkv
    kernel = functools.partial(_attn_kernel, num_heads=H, head_dim=D)
    return pl.pallas_call(
        kernel,
        out_shape=jax.ShapeDtypeStruct((L, B, E), jnp.bfloat16),
        grid=(B, n_q, n_kv),
        in_specs=[
            pl.BlockSpec((tq, None, E), lambda b, qi, ki: (qi, b * nq + cq, 0)),
            # If the KV DMA shows up exposed in a trace (v7x), add
            # pipeline_mode=pl.Buffered(3) on the k/v specs.
            pl.BlockSpec((tkv, None, E), lambda b, qi, ki: (ki, b * nk + ck, 0)),
            pl.BlockSpec((tkv, None, E), lambda b, qi, ki: (ki, b * nv + cv, 0)),
        ],
        out_specs=pl.BlockSpec((tq, None, E), lambda b, qi, ki: (qi, b, 0)),
        scratch_shapes=[
            pltpu.VMEM((tq, H), jnp.float32),   # running max (per-head column)
            pltpu.VMEM((tq, H), jnp.float32),   # running denominator
            pltpu.VMEM((tq, E), jnp.float32),   # lane-dense output accumulator
        ],
        compiler_params=pltpu.CompilerParams(
            dimension_semantics=("parallel", "parallel", "arbitrary"),
            vmem_limit_bytes=64 * 1024 * 1024),
    )(q, k, v)


def prepare_mha_params(params, num_heads):
    """One-time weight prep (chunk, scale, stack, transpose, bf16 cast),
    hoisted out of the per-call path.

    chunk(3): Q and K share the first chunk; V uses the third; middle unused.
    The softmax 1/sqrt(D) is folded as D**-0.25 into the shared w_qk/b_qk, so
    (q')@(k')^T carries exactly 1/sqrt(D) and the kernel applies no scale."""
    E = params["out_proj_weight"].shape[0]
    D = E // num_heads
    s = float(D) ** -0.25
    in_w = params["in_proj_weight"].astype(jnp.float32)
    in_b = params["in_proj_bias"].astype(jnp.float32)
    w_qk = in_w[0:E] * s
    w_v = in_w[2 * E:3 * E]
    b_qk = in_b[0:E] * s
    b_v = in_b[2 * E:3 * E]
    return {
        "wqk_t": w_qk.T.astype(jnp.bfloat16),              # (E, E)
        "bqk": b_qk,                                       # (E,)
        "wv_t": w_v.T.astype(jnp.bfloat16),                # (E, E)
        "bv": b_v,                                         # (E,)
        # stacked [w_qk*s ; w_v]: one projection yields the (shared) Q/K chunk
        # and the V chunk -> (rows, 2E); K is never projected twice.
        "wqkv_t": jnp.concatenate([w_qk, w_v], axis=0).T.astype(jnp.bfloat16),
        "bqkv": jnp.concatenate([b_qk, b_v], axis=0),      # (2E,)
        "wout_t": params["out_proj_weight"].T.astype(jnp.bfloat16),
        "bout": params["out_proj_bias"].astype(jnp.float32),
    }


def modified_mha_forward(query, key, value, prep, num_heads):
    """Mirror of ModifiedMultiheadAttention.forward (batch_first=False).

    query: (L, B, E), key/value: (S, B, E) float32.
    Returns (attn_output (L, B, E) f32, None)."""
    L, B, E = query.shape
    S = key.shape[0]
    H = num_heads
    D = E // H
    assert H * D == E

    if key is value:
        if query is key:
            # Self-attention: ONE fused projection -> (L*B, 2E); the free
            # reshape to (L, B*2, E) lets the attention index_maps read the
            # shared Q/K chunk (0) and the V chunk (1) directly.
            qkv = pallas_linear(query.reshape(L * B, E), prep["wqkv_t"],
                                prep["bqkv"], out_dtype=jnp.bfloat16)
            qkv3 = qkv.reshape(L, B * 2, E)
            attn = pallas_attention(qkv3, qkv3, qkv3, batch=B, num_heads=H,
                                    head_dim=D, chunks=(0, 0, 1),
                                    nchunks=(2, 2, 2))
        else:
            # Cross-attention with key is value: Q projection + fused K/V
            # projection (key read from HBM once, w_qk DMA'd once).
            q = pallas_linear(query.reshape(L * B, E), prep["wqk_t"],
                              prep["bqk"], out_dtype=jnp.bfloat16)
            kv = pallas_linear(key.reshape(S * B, E), prep["wqkv_t"],
                               prep["bqkv"], out_dtype=jnp.bfloat16)
            kv3 = kv.reshape(S, B * 2, E)
            attn = pallas_attention(q.reshape(L, B, E), kv3, kv3, batch=B,
                                    num_heads=H, head_dim=D,
                                    chunks=(0, 0, 1), nchunks=(1, 2, 2))
    else:
        # Fully general q/k/v: separate projections (Q and K both carry the
        # folded D**-0.25, so the product still carries exactly 1/sqrt(D)).
        q = pallas_linear(query.reshape(L * B, E), prep["wqk_t"], prep["bqk"],
                          out_dtype=jnp.bfloat16)
        k = pallas_linear(key.reshape(S * B, E), prep["wqk_t"], prep["bqk"],
                          out_dtype=jnp.bfloat16)
        v = pallas_linear(value.reshape(S * B, E), prep["wv_t"], prep["bv"],
                          out_dtype=jnp.bfloat16)
        attn = pallas_attention(q.reshape(L, B, E), k.reshape(S, B, E),
                                v.reshape(S, B, E), batch=B, num_heads=H,
                                head_dim=D)

    # (L, B, E) -> (L*B, E) is a free reshape matching torch's
    # transpose(0,1).contiguous().view(L*B, E) row/column order.
    out = pallas_linear(attn.reshape(L * B, E), prep["wout_t"], prep["bout"],
                        out_dtype=jnp.float32)
    return out.reshape(L, B, E), None


# ---------------------------- reference (pure JAX) -----------------------------


def _reference_forward(query, key, value, params, num_heads):
    L, B, E = query.shape
    S = key.shape[0]
    H = num_heads
    D = E // H
    in_w, in_b = params["in_proj_weight"], params["in_proj_bias"]
    w_qk, w_v = in_w[0:E], in_w[2 * E:3 * E]
    b_qk, b_v = in_b[0:E], in_b[2 * E:3 * E]
    q = query @ w_qk.T + b_qk
    k = key @ w_qk.T + b_qk
    v = value @ w_v.T + b_v
    q = q.reshape(L, B * H, D).transpose(1, 0, 2)
    k = k.reshape(S, B * H, D).transpose(1, 0, 2)
    v = v.reshape(S, B * H, D).transpose(1, 0, 2)
    s = (q / math.sqrt(D)) @ k.transpose(0, 2, 1)
    p = jax.nn.softmax(s, axis=-1)
    o = p @ v
    o = o.transpose(1, 0, 2).reshape(L * B, E)
    o = o @ params["out_proj_weight"].T + params["out_proj_bias"]
    return o.reshape(L, B, E)


# ------------------------------------ main -------------------------------------


def _xavier_uniform(key, shape):
    fan_out, fan_in = shape
    a = math.sqrt(6.0 / (fan_in + fan_out))
    return jax.random.uniform(key, shape, jnp.float32, minval=-a, maxval=a)


if __name__ == "__main__":
    embed_dim = 32
    num_heads = 4
    L = 8      # target sequence length
    S = 8      # source sequence length
    B = 2      # batch

    root = jax.random.PRNGKey(0)
    k_x, k_y, k_z, k_w_in, k_b_in, k_w_out, k_b_out = jax.random.split(root, 7)

    # deterministic synthetic parameters (shapes from the module __init__);
    # non-zero biases so the bias/chunk plumbing is actually exercised.
    params = {
        "in_proj_weight": _xavier_uniform(k_w_in, (3 * embed_dim, embed_dim)),
        "in_proj_bias": 0.1 * jax.random.normal(k_b_in, (3 * embed_dim,), jnp.float32),
        "out_proj_weight": _xavier_uniform(k_w_out, (embed_dim, embed_dim)),
        "out_proj_bias": 0.1 * jax.random.normal(k_b_out, (embed_dim,), jnp.float32),
    }
    prep = prepare_mha_params(params, num_heads)   # one-time weight prep

    x = jax.random.normal(k_x, (L, B, embed_dim), jnp.float32)   # (L, B, E)
    y = jax.random.normal(k_y, (S, B, embed_dim), jnp.float32)   # (S, B, E)
    z = jax.random.normal(k_z, (S, B, embed_dim), jnp.float32)   # (S, B, E)

    # bf16 MXU inputs -> compare against the f32 reference with bf16 tolerance.
    TOL = dict(atol=5e-2, rtol=5e-2)

    # 1) self-attention (fused shared-QK + V projection path)
    out, attn_w = modified_mha_forward(x, x, x, prep, num_heads)
    out = jax.block_until_ready(out)
    ref = _reference_forward(x, x, x, params, num_heads)
    assert out.shape == (L, B, embed_dim)
    assert attn_w is None
    assert jnp.allclose(out, ref, **TOL), "self-attn mismatch vs reference"

    # 2) cross-attention, key is value (fused K/V projection path)
    out2, _ = modified_mha_forward(x, y, y, prep, num_heads)
    out2 = jax.block_until_ready(out2)
    ref2 = _reference_forward(x, y, y, params, num_heads)
    assert out2.shape == (L, B, embed_dim)
    assert jnp.allclose(out2, ref2, **TOL), "cross-attn (k is v) mismatch"

    # 3) fully general query/key/value (separate projection path)
    out3, _ = modified_mha_forward(x, y, z, prep, num_heads)
    out3 = jax.block_until_ready(out3)
    ref3 = _reference_forward(x, y, z, params, num_heads)
    assert out3.shape == (L, B, embed_dim)
    assert jnp.allclose(out3, ref3, **TOL), "general q/k/v mismatch"

    print("KERNEL_OK")
</pallas_src>

<mosaic_0001>
module attributes {stable_mosaic.version = 11 : i64} {
  func.func @_linear_kernel(%arg0: i32, %arg1: i32, %arg2: i32, %arg3: memref<16x32xf32, #tpu.memory_space<vmem>>, %arg4: memref<32x64xbf16, #tpu.memory_space<vmem>>, %arg5: memref<1x64xf32, #tpu.memory_space<vmem>>, %arg6: memref<16x64xbf16, #tpu.memory_space<vmem>>, %arg7: memref<16x64xf32, #tpu.memory_space<vmem>>) attributes {dimension_semantics = [#tpu.dimension_semantics<parallel>, #tpu.dimension_semantics<parallel>, #tpu.dimension_semantics<arbitrary>], iteration_bounds = array<i64: 1, 1, 1>, scalar_prefetch = 0 : i64, scratch_operands = 1 : i64, tpu.core_type = #tpu.core_type<tc>, window_params = [{transform_indices = @transform_0, window_bounds = array<i64: 16, 32>}, {transform_indices = @transform_1, window_bounds = array<i64: 32, 64>}, {transform_indices = @transform_2, window_bounds = array<i64: 1, 64>}, {transform_indices = @transform_3, window_bounds = array<i64: 16, 64>}]} {
    %c0_i32 = arith.constant 0 : i32
    %0 = arith.cmpi eq, %arg2, %c0_i32 : i32
    %1 = arith.extui %0 : i1 to i32
    %c0_i32_0 = arith.constant 0 : i32
    %2 = arith.cmpi ne, %1, %c0_i32_0 : i32
    scf.if %2 {
      %cst_10 = arith.constant 0.000000e+00 : f32
      %13 = vector.broadcast %cst_10 : f32 to vector<16x64xf32>
      %c0_11 = arith.constant 0 : index
      %c0_12 = arith.constant 0 : index
      %14 = vector.load %arg7[%c0_11, %c0_12] : memref<16x64xf32, #tpu.memory_space<vmem>>, vector<16x64xf32>
      tpu.vector_store %arg7[%c0_11, %c0_12], %13 {strides = array<i32>} : memref<16x64xf32, #tpu.memory_space<vmem>>, vector<16x64xf32>,
    } else {
    }
    %c0 = arith.constant 0 : index
    %c0_1 = arith.constant 0 : index
    %3 = vector.load %arg7[%c0, %c0_1] : memref<16x64xf32, #tpu.memory_space<vmem>>, vector<16x64xf32>
    %c0_2 = arith.constant 0 : index
    %c0_3 = arith.constant 0 : index
    %4 = vector.load %arg3[%c0_2, %c0_3] : memref<16x32xf32, #tpu.memory_space<vmem>>, vector<16x32xf32>
    %5 = arith.truncf %4 : vector<16x32xf32> to vector<16x32xbf16>
    %c0_4 = arith.constant 0 : index
    %c0_5 = arith.constant 0 : index
    %6 = vector.load %arg4[%c0_4, %c0_5] : memref<32x64xbf16, #tpu.memory_space<vmem>>, vector<32x64xbf16>
    %cst = arith.constant dense<0.000000e+00> : vector<16x64xf32>
    %7 = tpu.matmul %5, %6, %cst {dimension_numbers = #tpu.dot_dimension_numbers<[1], [0], [0], [1], [0, 0, 1, 1], [], []>} : vector<16x32xbf16>, vector<32x64xbf16>, vector<16x64xf32> -> vector<16x64xf32>
    %8 = arith.addf %3, %7 : vector<16x64xf32>
    %c0_6 = arith.constant 0 : index
    %c0_7 = arith.constant 0 : index
    %9 = vector.load %arg7[%c0_6, %c0_7] : memref<16x64xf32, #tpu.memory_space<vmem>>, vector<16x64xf32>
    tpu.vector_store %arg7[%c0_6, %c0_7], %8 {strides = array<i32>} : memref<16x64xf32, #tpu.memory_space<vmem>>, vector<16x64xf32>,
    %c0_i32_8 = arith.constant 0 : i32
    %10 = arith.cmpi eq, %arg2, %c0_i32_8 : i32
    %11 = arith.extui %10 : i1 to i32
    %c0_i32_9 = arith.constant 0 : i32
    %12 = arith.cmpi ne, %11, %c0_i32_9 : i32
    scf.if %12 {
      %c0_10 = arith.constant 0 : index
      %c0_11 = arith.constant 0 : index
      %13 = vector.load %arg7[%c0_10, %c0_11] : memref<16x64xf32, #tpu.memory_space<vmem>>, vector<16x64xf32>
      %c0_12 = arith.constant 0 : index
      %c0_13 = arith.constant 0 : index
      %14 = vector.load %arg5[%c0_12, %c0_13] : memref<1x64xf32, #tpu.memory_space<vmem>>, vector<1x64xf32>
      %15 = vector.broadcast %14 : vector<1x64xf32> to vector<16x64xf32>
      %16 = arith.addf %13, %15 : vector<16x64xf32>
      %17 = arith.truncf %16 : vector<16x64xf32> to vector<16x64xbf16>
      %c0_14 = arith.constant 0 : index
      %c0_15 = arith.constant 0 : index
      %18 = vector.load %arg6[%c0_14, %c0_15] : memref<16x64xbf16, #tpu.memory_space<vmem>>, vector<16x64xbf16>
      tpu.vector_store %arg6[%c0_14, %c0_15], %17 {strides = array<i32>} : memref<16x64xbf16, #tpu.memory_space<vmem>>, vector<16x64xbf16>,
    } else {
    }
    return
  }
  func.func @transform_0(%arg0: i32, %arg1: i32, %arg2: i32) -> (i32, i32) {
    %c0_i32 = arith.constant 0 : i32
    return %arg0, %arg2 : i32, i32
  }
  func.func @transform_1(%arg0: i32, %arg1: i32, %arg2: i32) -> (i32, i32) {
    %c0_i32 = arith.constant 0 : i32
    return %arg2, %arg1 : i32, i32
  }
  func.func @transform_2(%arg0: i32, %arg1: i32, %arg2: i32) -> (i32, i32) {
    %c0_i32 = arith.constant 0 : i32
    %c0_i32_0 = arith.constant 0 : i32
    return %c0_i32, %arg1 : i32, i32
  }
  func.func @transform_3(%arg0: i32, %arg1: i32, %arg2: i32) -> (i32, i32) {
    %c0_i32 = arith.constant 0 : i32
    return %arg0, %arg1 : i32, i32
  }
}

</mosaic_0001>

<bundles_post_ra>
// kernel: tpu_custom_call.1
= control target key start
LH: loop header
LB: loop body
LE: loop exit
PB: predicated region body
PF: predicated region fallthrough
CT: control target
= control target key end

     0   :  { %8 = vsyncpa [#allocation4], 0  ;;  %s312_s0 = inlined_call_operand.hbm [shape: f32[16,32], index: 0, kind: input, shape index: {}]   ;;  %s313_s1 = inlined_call_operand.hbm [shape: bf16[32,64], index: 1, kind: input, shape index: {}]   ;;  %s314_s2 = inlined_call_operand.vmem [shape: f32[1,64], index: 2, kind: input, shape index: {}]   ;;  %s315_s3 = inlined_call_operand.hbm [shape: bf16[16,64], index: 3, kind: output, shape index: {}]  }
   0x1   :  { %9 = vsyncpa [#allocation7], 0 }
   0x2   :  { %10 = vsyncpa [#allocation5], 0  ;;  %s261_s12 = smov [#allocation3]  }
   0x3   :  { %s16_s13 = sshll.u32 %s261_s12, 4  ;;  %s17_s13 = int_to_ptr.vmem [resolvable:$true] %s16_s13 }
   0x4   :  { %s203_s14 = scalar_lea.vmem %s17_s13, 256  ;;  %p208_p1 = scmp.lt.s32.totalorder %s17_s13, %s17_s13 }
   0x5   :  { %p204_p0 = scmp.ne.s32.totalorder %s17_s13, %s203_s14  ;;  %p209_p2 = scmp.lt.s32.totalorder %s203_s14, %s203_s14 }
   0x7   :  { %p210_p3 = por %p209_p2, %p208_p1 }
   0x9   :  { %p211_p4 = pnand %p210_p3, %p204_p0 }
   0xb   :  { %214 = shalt.err (!%p211_p4)
}
   0xc   :  { %s262_s15 = smov 128   ;;  %s263_s16 = smov 8  }
   0xd   :  { %22 = dma.hbm_to_vmem [thread:$0]  %s312_s0, 256, %s17_s13, [#allocation4], %s262_s15, %s262_s15, %s263_s16  }
   0xe   :  { %s264_s19 = smov [#allocation6]  }
   0xf   :  { %s28_s20 = sshll.u32 %s264_s19, 4  ;;  %s29_s20 = int_to_ptr.vmem [resolvable:$true] %s28_s20 }
  0x10   :  { %s223_s21 = scalar_lea.vmem %s29_s20, 256  ;;  %p228_p6 = scmp.lt.s32.totalorder %s29_s20, %s29_s20 }
  0x11   :  { %p224_p5 = scmp.ne.s32.totalorder %s29_s20, %s223_s21  ;;  %p229_p7 = scmp.lt.s32.totalorder %s223_s21, %s223_s21 }
  0x13   :  { %p230_p8 = por %p229_p7, %p228_p6 }
  0x15   :  { %p231_p9 = pnand %p230_p8, %p224_p5 }
  0x17   :  { %234 = shalt.err (!%p231_p9)
}
  0x18   :  { %s265_s22 = smov 64   ;;  %s266_s23 = smov 4  }
  0x19   :  { %34 = dma.hbm_to_vmem [thread:$0]  %s313_s1, 256, %s29_s20, [#allocation7], %s265_s22, %s265_s22, %s266_s23  }
  0x1a   :  { %255 = dma.done.wait [#allocation4], 256  }
  0x1b   :  { %256 = vsyncadd [#allocation4], 4294967040 }
  0x1c   :  { %257 = dma.done.wait [#allocation7], 256  }
  0x1d   :  { %258 = vsyncadd [#allocation7], 4294967040  ;;  %vm48_vm0 = vcmask 523264   ;;  %v267_v0 = vmov 0.0   ;;  %vm268_vm1 = vmmov 0   ;;  %v193_v1 = vld [vmem:[#allocation6 + $0x8] sm:$0xff]  }
  0x1e   :  { %49 = vst.msk [vmem:[#allocation2] sm:$0xff] %vm48_vm0, %v267_v0  ;;  %50 = vst.msk [vmem:[#allocation2 + $0x8] sm:$0xff] %vm48_vm0, %v267_v0  ;;  %176 = vmatprep.subr.bf16.mxu0 %v267_v0  ;;  %180 = vmatprep.mubr.msk.bf16.mxu0 %vm268_vm1, %v267_v0  ;;  %v194_v2 = vld [vmem:[#allocation6] sm:$0xff]   ;;  %v53_v3 = vld [vmem:[#allocation3] sm:$0xff]  ;;  %vm72_vm2 = vcmask 261120   ;;  %vm144_vm3 = vcmask 519168  }
  0x1f   :  { %177 = vmatpush3.bf16.msra.mxu0 %v193_v1  ;;  %v54_v4 = vld [vmem:[#allocation3 + $0x8] sm:$0xff]  ;;  %v168_v14 = vld [vmem:[%s314_s2] ss:$0 sm:$0xff]  ;;  %s269_s26 = smov [#allocation8]  }
  0x20   :  { %178 = vmatprep.subr.bf16.mxu0 %v267_v0  ;;  %v55_v5 = vpack.c.bf16 %v54_v4, %v53_v3  ;;  %s152_s27 = sshll.u32 %s269_s26, 4  ;;  %s153_s27 = int_to_ptr.vmem [resolvable:$true] %s152_s27 }
  0x21   :  { %s235_s28 = scalar_lea.vmem %s153_s27, 128  ;;  %p240_p11 = scmp.lt.s32.totalorder %s153_s27, %s153_s27 }
  0x22   :  { %p236_p10 = scmp.ne.s32.totalorder %s153_s27, %s235_s28  ;;  %p241_p12 = scmp.lt.s32.totalorder %s235_s28, %s235_s28 }
  0x23   :  { %179 = vmatpush3.bf16.msra.mxu0 %v194_v2 }
  0x24   :  { %p242_p13 = por %p241_p12, %p240_p11 }
  0x25   :  { %v51_v6 = vld [vmem:[#allocation2] sm:$0xff]  ;;  %v52_v10 = vld [vmem:[#allocation2 + $0x8] sm:$0xff] }
  0x26   :  { %181 = vmatmul.mubr.msk.bf16.vlgmr.msra.gmra.mxu0 %vm72_vm2, %v55_v5  ;;  %p243_p0 = pnand %p242_p13, %p236_p10 }
  0xe6   :  { %v110_v7 = vpop.f32.mrf.mxu0 }
  0xe7   :  { %v117_v8 = vadd.f32 %v110_v7, %v51_v6 }
  0xe8   :  { %v182_v9 = vpop.f32.mrf.mxu0 }
  0xe9   :  { %120 = vst.msk [vmem:[#allocation2] sm:$0xff] %vm48_vm0, %v117_v8 }
  0xea   :  { %v113_v11 = vpop.f32.mrf.mxu0 }
  0xeb   :  { %v118_v12 = vadd.f32 %v113_v11, %v52_v10 }
  0xec   :  { %v183_v13 = vpop.f32.mrf.mxu0 }
  0xed   :  { %121 = vst.msk [vmem:[#allocation2 + $0x8] sm:$0xff] %vm48_vm0, %v118_v12 }
  0xf0   :  { %v125_v15 = vld [vmem:[#allocation2] sm:$0xff] }
  0xf1   :  { %v134_v16 = vadd.f32 %v168_v14, %v125_v15 }
  0xf3   :  { %v171_v17 = vpack.c.bf16 %v134_v16, %v134_v16 }
  0xf4   :  { %v126_v18 = vld [vmem:[#allocation2 + $0x8] sm:$0xff] }
  0xf5   :  { %v135_v19 = vadd.f32 %v168_v14, %v126_v18  ;;  %145 = vst.msk [vmem:[#allocation8] sm:$0xf] %vm144_vm3, %v171_v17 }
  0xf7   :  { %v172_v20 = vpack.c.bf16 %v135_v19, %v135_v19 }
  0xf9   :  { %146 = vst.msk [vmem:[#allocation8 + $0x4] sm:$0xf] %vm144_vm3, %v172_v20 }
  0xfa   :  { %246 = shalt.err (!%p243_p0)
}
  0xfb   :  { %158 = dma.vmem_to_hbm [thread:$0]  %s153_s27, 128, %s315_s3, [#allocation5], %s265_s22, %s265_s22, %s266_s23  }
  0xfc   :  { %259 = dma.done.wait [#allocation5], 128  }
  0xfd   :  { %260 = vsyncadd [#allocation5], 4294967168 }
  0xfe   :  { %162 = vsyncpa [#allocation4], 1 }
  0xff   :  { %163 = vsyncpa [#allocation7], 1 }
 0x100   :  { %164 = vsyncpa [#allocation5], 1 }

</bundles_post_ra>
